<compile_context>
chip_gen: v7x
topology: tpu7x:2x2x1
jax: 0.10.0
libtpu: 0.0.40
codegen_flags: <defaults>
</compile_context>

<pallas_src>
import functools

import jax
import jax.numpy as jnp
from jax.experimental import pallas as pl
from jax.experimental.pallas import tpu as pltpu

LOG_STD_MIN = -10.0
LOG_STD_MAX = 1.0
LEAKY_SLOPE = 0.01
HIDDEN = 256
TILE_B_MAX = 1024  # big tile amortizes grid-step overhead; VMEM footprint ~4-6 MB


def _round_up(n, m):
    return ((n + m - 1) // m) * m


def _leaky_relu(x):
    return jnp.where(x > 0, x, LEAKY_SLOPE * x)


def policy_kernel(x_ref, w1_ref, b1_ref, w2_ref, b2_ref, wh_ref, bh_ref,
                  lo_ref, hi_ref, out_ref):
    # Layer 1: cast the f32 x tile to bf16 in VMEM (no wrapper-side cast pass),
    # bf16 MXU inputs, f32 accumulation.
    x = x_ref[...].astype(jnp.bfloat16)
    h = jnp.dot(x, w1_ref[...], preferred_element_type=jnp.float32)
    h = _leaky_relu(h + b1_ref[...])

    # Layer 2 (dominant FLOPs): cast activations to bf16 only at the MXU boundary.
    h = jnp.dot(h.astype(jnp.bfloat16), w2_ref[...],
                preferred_element_type=jnp.float32)
    h = _leaky_relu(h + b2_ref[...])

    # Fused, 128-lane-padded mu|log_std head: one MXU push, one unmasked
    # lane-dense [tile_b, 128] store.
    head = jnp.dot(h.astype(jnp.bfloat16), wh_ref[...],
                   preferred_element_type=jnp.float32)
    head = head + bh_ref[...]

    # Per-column clamp rows: no-op (-inf/+inf) on mu & padding lanes,
    # [-10, 1] on the log_std lanes. Replaces the old iota/where mask.
    out_ref[...] = jnp.minimum(jnp.maximum(head, lo_ref[...]), hi_ref[...])


def prepare_params(params):
    """One-time parameter conversion (do this OUTSIDE the per-step hot path):
       - transpose PyTorch (out, in) weights to (in, out)
       - cast weights to bf16 (kernel accumulates in f32)
       - fuse mu / std heads into a single [HIDDEN, head_w] weight where
         head_w is the 128-lane-padded width (lane-dense output store)
       - build per-column clamp rows for the log_std clip
       - biases kept in f32 as [1, out] rows
    """
    bf = jnp.bfloat16
    f = jnp.float32
    action_dim = params["w_mu"].shape[0]
    head_w = max(128, _round_up(2 * action_dim, 128))
    pad = head_w - 2 * action_dim

    w_head = jnp.concatenate([params["w_mu"].T, params["w_std"].T], axis=1)
    b_head = jnp.concatenate([params["b_mu"], params["b_std"]])
    w_head = jnp.pad(w_head, ((0, 0), (0, pad)))
    b_head = jnp.pad(b_head, (0, pad))

    clip_lo = jnp.full((head_w,), -jnp.inf, f)
    clip_hi = jnp.full((head_w,), jnp.inf, f)
    clip_lo = clip_lo.at[action_dim:2 * action_dim].set(LOG_STD_MIN)
    clip_hi = clip_hi.at[action_dim:2 * action_dim].set(LOG_STD_MAX)

    return {
        "w1": params["w1"].T.astype(bf),
        "b1": params["b1"].reshape(1, -1).astype(f),
        "w2": params["w2"].T.astype(bf),
        "b2": params["b2"].reshape(1, -1).astype(f),
        "w_head": w_head.astype(bf),
        "b_head": b_head.reshape(1, -1).astype(f),
        "clip_lo": clip_lo.reshape(1, -1),
        "clip_hi": clip_hi.reshape(1, -1),
    }


@functools.partial(jax.jit, static_argnames=("action_dim",))
def policy_forward(x, prep, *, action_dim):
    batch, state_dim = x.shape
    head_w = prep["w_head"].shape[1]

    # Batch tile: as large as possible (amortize the ~0.35us grid-step cost) but
    # capped at ceil(batch/2) rounded to a sublane multiple so the grid keeps
    # >= 2 "parallel" steps for v7x's two TensorCores.
    half = _round_up(max(1, -(-batch // 2)), 8)
    tile_b = max(8, min(TILE_B_MAX, _round_up(batch, 8), half))
    grid = (pl.cdiv(batch, tile_b),)

    const = lambda i: (0, 0)  # weights/biases/clamps: same block every step

    flops = 2 * batch * (state_dim * HIDDEN + HIDDEN * HIDDEN + HIDDEN * head_w)
    bytes_accessed = (x.size * 4
                      + sum(prep[k].size * 2 for k in ("w1", "w2", "w_head"))
                      + sum(prep[k].size * 4
                            for k in ("b1", "b2", "b_head", "clip_lo", "clip_hi"))
                      + batch * head_w * 4)

    out = pl.pallas_call(
        policy_kernel,
        out_shape=jax.ShapeDtypeStruct((batch, head_w), jnp.float32),
        grid_spec=pltpu.PrefetchScalarGridSpec(
            num_scalar_prefetch=0,
            grid=grid,
            in_specs=[
                pl.BlockSpec((tile_b, state_dim), lambda i: (i, 0)),  # x tile (f32)
                pl.BlockSpec((state_dim, HIDDEN), const),             # w1
                pl.BlockSpec((1, HIDDEN), const),                     # b1
                pl.BlockSpec((HIDDEN, HIDDEN), const),                # w2
                pl.BlockSpec((1, HIDDEN), const),                     # b2
                pl.BlockSpec((HIDDEN, head_w), const),                # fused head W
                pl.BlockSpec((1, head_w), const),                     # fused head b
                pl.BlockSpec((1, head_w), const),                     # clamp lo
                pl.BlockSpec((1, head_w), const),                     # clamp hi
            ],
            out_specs=pl.BlockSpec((tile_b, head_w), lambda i: (i, 0)),
        ),
        compiler_params=pltpu.CompilerParams(
            dimension_semantics=("parallel",)),
        cost_estimate=pl.CostEstimate(flops=flops, transcendentals=0,
                                      bytes_accessed=bytes_accessed),
    )(x, prep["w1"], prep["b1"], prep["w2"], prep["b2"],
      prep["w_head"], prep["b_head"], prep["clip_lo"], prep["clip_hi"])

    mu = out[:, :action_dim]
    log_std = out[:, action_dim:2 * action_dim]
    return mu, log_std


def init_params(key, state_dim, action_dim):
    ks = jax.random.split(key, 8)

    def lin(kw, kb, fan_in, fan_out):
        # PyTorch nn.Linear default init: U(-1/sqrt(fan_in), 1/sqrt(fan_in))
        bound = 1.0 / jnp.sqrt(fan_in)
        w = jax.random.uniform(kw, (fan_out, fan_in), jnp.float32, -bound, bound)
        b = jax.random.uniform(kb, (fan_out,), jnp.float32, -bound, bound)
        return w, b

    w1, b1 = lin(ks[0], ks[1], state_dim, HIDDEN)
    w2, b2 = lin(ks[2], ks[3], HIDDEN, HIDDEN)
    wmu, bmu = lin(ks[4], ks[5], HIDDEN, action_dim)
    wstd, bstd = lin(ks[6], ks[7], HIDDEN, action_dim)
    return {"w1": w1, "b1": b1, "w2": w2, "b2": b2,
            "w_mu": wmu, "b_mu": bmu, "w_std": wstd, "b_std": bstd}


def reference_forward(x, params):
    """Pure-f32 PyTorch-convention reference."""
    h = x @ params["w1"].T + params["b1"]
    h = jnp.where(h > 0, h, LEAKY_SLOPE * h)
    h = h @ params["w2"].T + params["b2"]
    h = jnp.where(h > 0, h, LEAKY_SLOPE * h)
    mu = h @ params["w_mu"].T + params["b_mu"]
    ls = jnp.clip(h @ params["w_std"].T + params["b_std"], LOG_STD_MIN, LOG_STD_MAX)
    return mu, ls


def reference_forward_prepared(x, prep, action_dim):
    """Reference that mirrors the kernel's bf16-input / f32-accumulate dtypes."""
    h = jnp.dot(x.astype(jnp.bfloat16), prep["w1"],
                preferred_element_type=jnp.float32) + prep["b1"]
    h = jnp.where(h > 0, h, LEAKY_SLOPE * h)
    h = jnp.dot(h.astype(jnp.bfloat16), prep["w2"],
                preferred_element_type=jnp.float32) + prep["b2"]
    h = jnp.where(h > 0, h, LEAKY_SLOPE * h)
    head = jnp.dot(h.astype(jnp.bfloat16), prep["w_head"],
                   preferred_element_type=jnp.float32) + prep["b_head"]
    mu = head[:, :action_dim]
    ls = jnp.clip(head[:, action_dim:2 * action_dim], LOG_STD_MIN, LOG_STD_MAX)
    return mu, ls


# TODO(synk): `sample()` (Normal rsample + tanh squash + log_prob) and the Adam
# optimizer are host-side training/sampling logic; only forward() is in-kernel.

if __name__ == "__main__":
    key = jax.random.PRNGKey(0)
    k_params, k_x, k_x2, k_x3 = jax.random.split(key, 4)

    batch, state_dim, action_dim = 8, 16, 4
    params = init_params(k_params, state_dim, action_dim)
    prep = prepare_params(params)  # one-time: transpose, fuse+pad head, bf16 cast

    x = jax.random.normal(k_x, (batch, state_dim), jnp.float32)
    mu, log_std = policy_forward(x, prep, action_dim=action_dim)
    jax.block_until_ready((mu, log_std))

    assert mu.shape == (batch, action_dim) and log_std.shape == (batch, action_dim)

    # Tight check against a reference that mirrors the kernel's dtypes.
    mu_r, ls_r = reference_forward_prepared(x, prep, action_dim)
    assert jnp.allclose(mu, mu_r, atol=1e-3, rtol=1e-3)
    assert jnp.allclose(log_std, ls_r, atol=1e-3, rtol=1e-3)

    # Loose sanity check against the pure-f32 reference (bf16 weight rounding).
    mu_f, ls_f = reference_forward(x, params)
    assert jnp.allclose(mu, mu_f, atol=7e-2, rtol=7e-2)
    assert jnp.allclose(log_std, ls_f, atol=7e-2, rtol=7e-2)

    # Boundary test 1: batch not a multiple of the tile -> partial last block
    # handled by Pallas (no wrapper pad), 2 parallel grid steps.
    x2 = jax.random.normal(k_x2, (600, state_dim), jnp.float32)
    mu2, ls2 = policy_forward(x2, prep, action_dim=action_dim)
    jax.block_until_ready((mu2, ls2))
    mu2_r, ls2_r = reference_forward_prepared(x2, prep, action_dim)
    assert mu2.shape == (600, action_dim) and ls2.shape == (600, action_dim)
    assert jnp.allclose(mu2, mu2_r, atol=1e-3, rtol=1e-3)
    assert jnp.allclose(ls2, ls2_r, atol=1e-3, rtol=1e-3)

    # Boundary test 2: tiny ragged batch (non-multiple of the 8-row sublane tile).
    x3 = jax.random.normal(k_x3, (13, state_dim), jnp.float32)
    mu3, ls3 = policy_forward(x3, prep, action_dim=action_dim)
    jax.block_until_ready((mu3, ls3))
    mu3_r, ls3_r = reference_forward_prepared(x3, prep, action_dim)
    assert mu3.shape == (13, action_dim) and ls3.shape == (13, action_dim)
    assert jnp.allclose(mu3, mu3_r, atol=1e-3, rtol=1e-3)
    assert jnp.allclose(ls3, ls3_r, atol=1e-3, rtol=1e-3)

    print("KERNEL_OK")
</pallas_src>

<mosaic_0001>
module attributes {stable_mosaic.version = 11 : i64} {
  func.func @policy_kernel(%arg0: i32, %arg1: memref<8x16xf32, #tpu.memory_space<vmem>>, %arg2: memref<16x256xbf16, #tpu.memory_space<vmem>>, %arg3: memref<1x256xf32, #tpu.memory_space<vmem>>, %arg4: memref<256x256xbf16, #tpu.memory_space<vmem>>, %arg5: memref<1x256xf32, #tpu.memory_space<vmem>>, %arg6: memref<256x128xbf16, #tpu.memory_space<vmem>>, %arg7: memref<1x128xf32, #tpu.memory_space<vmem>>, %arg8: memref<1x128xf32, #tpu.memory_space<vmem>>, %arg9: memref<1x128xf32, #tpu.memory_space<vmem>>, %arg10: memref<8x128xf32, #tpu.memory_space<vmem>>) attributes {dimension_semantics = [#tpu.dimension_semantics<parallel>], iteration_bounds = array<i64: 1>, scalar_prefetch = 0 : i64, scratch_operands = 0 : i64, tpu.core_type = #tpu.core_type<tc>, window_params = [{transform_indices = @transform_0, window_bounds = array<i64: 8, 16>}, {pipeline_mode = #tpu.pipeline_mode<synchronous>, transform_indices = @transform_1, window_bounds = array<i64: 16, 256>}, {pipeline_mode = #tpu.pipeline_mode<synchronous>, transform_indices = @transform_2, window_bounds = array<i64: 1, 256>}, {pipeline_mode = #tpu.pipeline_mode<synchronous>, transform_indices = @transform_3, window_bounds = array<i64: 256, 256>}, {pipeline_mode = #tpu.pipeline_mode<synchronous>, transform_indices = @transform_4, window_bounds = array<i64: 1, 256>}, {pipeline_mode = #tpu.pipeline_mode<synchronous>, transform_indices = @transform_5, window_bounds = array<i64: 256, 128>}, {pipeline_mode = #tpu.pipeline_mode<synchronous>, transform_indices = @transform_6, window_bounds = array<i64: 1, 128>}, {pipeline_mode = #tpu.pipeline_mode<synchronous>, transform_indices = @transform_7, window_bounds = array<i64: 1, 128>}, {pipeline_mode = #tpu.pipeline_mode<synchronous>, transform_indices = @transform_8, window_bounds = array<i64: 1, 128>}, {transform_indices = @transform_9, window_bounds = array<i64: 8, 128>}]} {
    %c0 = arith.constant 0 : index
    %c0_0 = arith.constant 0 : index
    %0 = vector.load %arg1[%c0, %c0_0] : memref<8x16xf32, #tpu.memory_space<vmem>>, vector<8x16xf32>
    %1 = arith.truncf %0 : vector<8x16xf32> to vector<8x16xbf16>
    %c0_1 = arith.constant 0 : index
    %c0_2 = arith.constant 0 : index
    %2 = vector.load %arg2[%c0_1, %c0_2] : memref<16x256xbf16, #tpu.memory_space<vmem>>, vector<16x256xbf16>
    %cst = arith.constant dense<0.000000e+00> : vector<8x256xf32>
    %3 = tpu.matmul %1, %2, %cst {dimension_numbers = #tpu.dot_dimension_numbers<[1], [0], [0], [1], [0, 0, 1, 1], [], []>} : vector<8x16xbf16>, vector<16x256xbf16>, vector<8x256xf32> -> vector<8x256xf32>
    %c0_3 = arith.constant 0 : index
    %c0_4 = arith.constant 0 : index
    %4 = vector.load %arg3[%c0_3, %c0_4] : memref<1x256xf32, #tpu.memory_space<vmem>>, vector<1x256xf32>
    %5 = vector.broadcast %4 : vector<1x256xf32> to vector<8x256xf32>
    %6 = arith.addf %3, %5 : vector<8x256xf32>
    %cst_5 = arith.constant 0.000000e+00 : f32
    %7 = vector.broadcast %cst_5 : f32 to vector<8x256xf32>
    %8 = arith.cmpf ogt, %6, %7 : vector<8x256xf32>
    %cst_6 = arith.constant 0.00999999977 : f32
    %9 = vector.broadcast %cst_6 : f32 to vector<8x256xf32>
    %10 = arith.mulf %9, %6 : vector<8x256xf32>
    %11 = arith.select %8, %6, %10 : vector<8x256xi1>, vector<8x256xf32>
    %12 = arith.truncf %11 : vector<8x256xf32> to vector<8x256xbf16>
    %c0_7 = arith.constant 0 : index
    %c0_8 = arith.constant 0 : index
    %13 = vector.load %arg4[%c0_7, %c0_8] : memref<256x256xbf16, #tpu.memory_space<vmem>>, vector<256x256xbf16>
    %cst_9 = arith.constant dense<0.000000e+00> : vector<8x256xf32>
    %14 = tpu.matmul %12, %13, %cst_9 {dimension_numbers = #tpu.dot_dimension_numbers<[1], [0], [0], [1], [0, 0, 1, 1], [], []>} : vector<8x256xbf16>, vector<256x256xbf16>, vector<8x256xf32> -> vector<8x256xf32>
    %c0_10 = arith.constant 0 : index
    %c0_11 = arith.constant 0 : index
    %15 = vector.load %arg5[%c0_10, %c0_11] : memref<1x256xf32, #tpu.memory_space<vmem>>, vector<1x256xf32>
    %16 = vector.broadcast %15 : vector<1x256xf32> to vector<8x256xf32>
    %17 = arith.addf %14, %16 : vector<8x256xf32>
    %cst_12 = arith.constant 0.000000e+00 : f32
    %18 = vector.broadcast %cst_12 : f32 to vector<8x256xf32>
    %19 = arith.cmpf ogt, %17, %18 : vector<8x256xf32>
    %cst_13 = arith.constant 0.00999999977 : f32
    %20 = vector.broadcast %cst_13 : f32 to vector<8x256xf32>
    %21 = arith.mulf %20, %17 : vector<8x256xf32>
    %22 = arith.select %19, %17, %21 : vector<8x256xi1>, vector<8x256xf32>
    %23 = arith.truncf %22 : vector<8x256xf32> to vector<8x256xbf16>
    %c0_14 = arith.constant 0 : index
    %c0_15 = arith.constant 0 : index
    %24 = vector.load %arg6[%c0_14, %c0_15] : memref<256x128xbf16, #tpu.memory_space<vmem>>, vector<256x128xbf16>
    %cst_16 = arith.constant dense<0.000000e+00> : vector<8x128xf32>
    %25 = tpu.matmul %23, %24, %cst_16 {dimension_numbers = #tpu.dot_dimension_numbers<[1], [0], [0], [1], [0, 0, 1, 1], [], []>} : vector<8x256xbf16>, vector<256x128xbf16>, vector<8x128xf32> -> vector<8x128xf32>
    %c0_17 = arith.constant 0 : index
    %c0_18 = arith.constant 0 : index
    %26 = vector.load %arg7[%c0_17, %c0_18] : memref<1x128xf32, #tpu.memory_space<vmem>>, vector<1x128xf32>
    %27 = vector.broadcast %26 : vector<1x128xf32> to vector<8x128xf32>
    %28 = arith.addf %25, %27 : vector<8x128xf32>
    %c0_19 = arith.constant 0 : index
    %c0_20 = arith.constant 0 : index
    %29 = vector.load %arg8[%c0_19, %c0_20] : memref<1x128xf32, #tpu.memory_space<vmem>>, vector<1x128xf32>
    %30 = vector.broadcast %29 : vector<1x128xf32> to vector<8x128xf32>
    %31 = arith.maximumf %28, %30 : vector<8x128xf32>
    %c0_21 = arith.constant 0 : index
    %c0_22 = arith.constant 0 : index
    %32 = vector.load %arg9[%c0_21, %c0_22] : memref<1x128xf32, #tpu.memory_space<vmem>>, vector<1x128xf32>
    %33 = vector.broadcast %32 : vector<1x128xf32> to vector<8x128xf32>
    %34 = arith.minimumf %31, %33 : vector<8x128xf32>
    %c0_23 = arith.constant 0 : index
    %c0_24 = arith.constant 0 : index
    %35 = vector.load %arg10[%c0_23, %c0_24] : memref<8x128xf32, #tpu.memory_space<vmem>>, vector<8x128xf32>
    tpu.vector_store %arg10[%c0_23, %c0_24], %34 {strides = array<i32>} : memref<8x128xf32, #tpu.memory_space<vmem>>, vector<8x128xf32>,
    return
  }
  func.func @transform_0(%arg0: i32) -> (i32, i32) {
    %c0_i32 = arith.constant 0 : i32
    %c0_i32_0 = arith.constant 0 : i32
    return %arg0, %c0_i32 : i32, i32
  }
  func.func @transform_1(%arg0: i32) -> (i32, i32) {
    %c0_i32 = arith.constant 0 : i32
    %c0_i32_0 = arith.constant 0 : i32
    %c0_i32_1 = arith.constant 0 : i32
    return %c0_i32, %c0_i32_0 : i32, i32
  }
  func.func @transform_2(%arg0: i32) -> (i32, i32) {
    %c0_i32 = arith.constant 0 : i32
    %c0_i32_0 = arith.constant 0 : i32
    %c0_i32_1 = arith.constant 0 : i32
    return %c0_i32, %c0_i32_0 : i32, i32
  }
  func.func @transform_3(%arg0: i32) -> (i32, i32) {
    %c0_i32 = arith.constant 0 : i32
    %c0_i32_0 = arith.constant 0 : i32
    %c0_i32_1 = arith.constant 0 : i32
    return %c0_i32, %c0_i32_0 : i32, i32
  }
  func.func @transform_4(%arg0: i32) -> (i32, i32) {
    %c0_i32 = arith.constant 0 : i32
    %c0_i32_0 = arith.constant 0 : i32
    %c0_i32_1 = arith.constant 0 : i32
    return %c0_i32, %c0_i32_0 : i32, i32
  }
  func.func @transform_5(%arg0: i32) -> (i32, i32) {
    %c0_i32 = arith.constant 0 : i32
    %c0_i32_0 = arith.constant 0 : i32
    %c0_i32_1 = arith.constant 0 : i32
    return %c0_i32, %c0_i32_0 : i32, i32
  }
  func.func @transform_6(%arg0: i32) -> (i32, i32) {
    %c0_i32 = arith.constant 0 : i32
    %c0_i32_0 = arith.constant 0 : i32
    %c0_i32_1 = arith.constant 0 : i32
    return %c0_i32, %c0_i32_0 : i32, i32
  }
  func.func @transform_7(%arg0: i32) -> (i32, i32) {
    %c0_i32 = arith.constant 0 : i32
    %c0_i32_0 = arith.constant 0 : i32
    %c0_i32_1 = arith.constant 0 : i32
    return %c0_i32, %c0_i32_0 : i32, i32
  }
  func.func @transform_8(%arg0: i32) -> (i32, i32) {
    %c0_i32 = arith.constant 0 : i32
    %c0_i32_0 = arith.constant 0 : i32
    %c0_i32_1 = arith.constant 0 : i32
    return %c0_i32, %c0_i32_0 : i32, i32
  }
  func.func @transform_9(%arg0: i32) -> (i32, i32) {
    %c0_i32 = arith.constant 0 : i32
    %c0_i32_0 = arith.constant 0 : i32
    return %arg0, %c0_i32 : i32, i32
  }
}

</mosaic_0001>

<bundles_post_ra>
// kernel: policy_forward.1
= control target key start
LH: loop header
LB: loop body
LE: loop exit
PB: predicated region body
PF: predicated region fallthrough
CT: control target
= control target key end

     0   :  { %14 = vsyncpa [#allocation3], 0  ;;  %s989_s0 = inlined_call_operand.hbm [shape: f32[8,16], index: 0, kind: input, shape index: {}]   ;;  %s990_s1 = inlined_call_operand.vmem [shape: bf16[16,256], index: 1, kind: input, shape index: {}]   ;;  %s991_s2 = inlined_call_operand.vmem [shape: f32[1,256], index: 2, kind: input, shape index: {}]   ;;  %s992_s3 = inlined_call_operand.hbm [shape: bf16[256,256], index: 3, kind: input, shape index: {}]   ;;  %s993_s4 = inlined_call_operand.vmem [shape: f32[1,256], index: 4, kind: input, shape index: {}]   ;;  %s994_s5 = inlined_call_operand.hbm [shape: bf16[256,128], index: 5, kind: input, shape index: {}]   ;;  %s995_s6 = inlined_call_operand.vmem [shape: f32[1,128], index: 6, kind: input, shape index: {}]   ;;  %s996_s7 = inlined_call_operand.vmem [shape: f32[1,128], index: 7, kind: input, shape index: {}]   ;;  %s997_s8 = inlined_call_operand.hbm [shape: f32[1,128], index: 8, kind: input, shape index: {}]   ;;  %s998_s9 = inlined_call_operand.vmem [shape: f32[8,128], index: 9, kind: output, shape index: {}]  }
   0x1   :  { %15 = vsyncpa [#allocation5], 0 }
   0x2   :  { %16 = vsyncpa [#allocation8], 0  ;;  %s861_s30 = smov [#allocation4]   ;;  %s767_s13 = scalar_lea.hbm %s992_s3, 4096 }
   0x3   :  { %s36_s10 = sshll.u32 %s861_s30, 4  ;;  %p768_p0 = scmp.ne.s32.totalorder %s992_s3, %s767_s13  ;;  %s37_s10 = int_to_ptr.vmem [resolvable:$true] %s36_s10 }
   0x4   :  { %p771_p1 = scmp.lt.u32.totalorder %s767_s13, %s992_s3 }
   0x6   :  { %p773_p2 = pnand %p771_p1, %p768_p0 }
   0x8   :  { %776 = shalt.err (!%p773_p2)
}
   0x9   :  { %s777_s18 = scalar_lea.vmem %s37_s10, 4096  ;;  %p782_p4 = scmp.lt.s32.totalorder %s37_s10, %s37_s10 }
   0xa   :  { %p778_p3 = scmp.ne.s32.totalorder %s37_s10, %s777_s18  ;;  %p783_p5 = scmp.lt.s32.totalorder %s777_s18, %s777_s18 }
   0xc   :  { %p784_p6 = por %p783_p5, %p782_p4 }
   0xe   :  { %p785_p7 = pnand %p784_p6, %p778_p3 }
  0x10   :  { %788 = shalt.err (!%p785_p7)
}
  0x11   :  { %s862_s19 = smov 128   ;;  %s863_s20 = smov 8  }
  0x12   :  { %42 = dma.hbm_to_vmem [thread:$0]  %s992_s3, 4096, %s37_s10, [#allocation5], %s862_s19, %s862_s19, %s863_s20  }
  0x13   :  { %s864_s23 = smov [#allocation2]   ;;  %s865_s25 = smov [#allocation6]  }
  0x14   :  { %s23_s24 = sshll.u32 %s864_s23, 4  ;;  %s50_s26 = sshll.u32 %s865_s25, 4  ;;  %s24_s24 = int_to_ptr.vmem [resolvable:$true] %s23_s24  ;;  %s51_s26 = int_to_ptr.vmem [resolvable:$true] %s50_s26 }
  0x15   :  { %s789_s29 = scalar_lea.hbm %s989_s0, 128 }
  0x16   :  { %p790_p8 = scmp.ne.s32.totalorder %s989_s0, %s789_s29  ;;  %p793_p9 = scmp.lt.u32.totalorder %s789_s29, %s989_s0 }
  0x18   :  { %p795_p10 = pnand %p793_p9, %p790_p8 }
  0x1a   :  { %798 = shalt.err (!%p795_p10)
}
  0x1b   :  { %s799_s3 = scalar_lea.vmem %s24_s24, 128  ;;  %p804_p12 = scmp.lt.s32.totalorder %s24_s24, %s24_s24 }
  0x1c   :  { %p800_p11 = scmp.ne.s32.totalorder %s24_s24, %s799_s3  ;;  %p805_p13 = scmp.lt.s32.totalorder %s799_s3, %s799_s3 }
  0x1e   :  { %p806_p0 = por %p805_p13, %p804_p12 }
  0x20   :  { %p807_p1 = pnand %p806_p0, %p800_p11 }
  0x22   :  { %810 = shalt.err (!%p807_p1)
}
  0x23   :  { %26 = dma.hbm_to_vmem [thread:$0]  %s989_s0, 128, %s24_s24, [#allocation3]  }
  0x24   :  { %s811_s17 = scalar_lea.hbm %s994_s5, 2048 }
  0x25   :  { %p812_p2 = scmp.ne.s32.totalorder %s994_s5, %s811_s17  ;;  %p815_p3 = scmp.lt.u32.totalorder %s811_s17, %s994_s5 }
  0x27   :  { %p817_p4 = pnand %p815_p3, %p812_p2 }
  0x29   :  { %820 = shalt.err (!%p817_p4)
}
  0x2a   :  { %s821_s22 = scalar_lea.vmem %s51_s26, 2048  ;;  %p826_p6 = scmp.lt.s32.totalorder %s51_s26, %s51_s26 }
  0x2b   :  { %p822_p5 = scmp.ne.s32.totalorder %s51_s26, %s821_s22  ;;  %p827_p7 = scmp.lt.s32.totalorder %s821_s22, %s821_s22 }
  0x2d   :  { %p828_p8 = por %p827_p7, %p826_p6 }
  0x2f   :  { %p829_p9 = pnand %p828_p8, %p822_p5 }
  0x31   :  { %832 = shalt.err (!%p829_p9)
}
  0x32   :  { %s866_s0 = smov 64   ;;  %s867_s23 = smov 4  }
  0x33   :  { %56 = dma.hbm_to_vmem [thread:$0]  %s994_s5, 2048, %s51_s26, [#allocation5], %s866_s0, %s866_s0, %s867_s23  }
  0x34   :  { %s868_s27 = smov [#allocation7]   ;;  %s833_s11 = scalar_lea.hbm %s997_s8, 16 }
  0x35   :  { %s67_s28 = sshll.u32 %s868_s27, 4  ;;  %p834_p10 = scmp.ne.s32.totalorder %s997_s8, %s833_s11  ;;  %s68_s28 = int_to_ptr.vmem [resolvable:$true] %s67_s28 }
  0x36   :  { %p837_p11 = scmp.lt.u32.totalorder %s833_s11, %s997_s8 }
  0x38   :  { %p839_p12 = pnand %p837_p11, %p834_p10 }
  0x3a   :  { %842 = shalt.err (!%p839_p12)
}
  0x3b   :  { %s843_s14 = scalar_lea.vmem %s68_s28, 16  ;;  %s847_s5 = scalar_lea.vmem %s68_s28, 32 }
  0x3c   :  { %p844_p13 = scmp.ne.s32.totalorder %s68_s28, %s843_s14  ;;  %p848_p0 = scmp.lt.s32.totalorder %s68_s28, %s68_s28 }
  0x3d   :  { %p849_p1 = scmp.lt.s32.totalorder %s847_s5, %s843_s14 }
  0x3f   :  { %p850_p2 = por %p849_p1, %p848_p0 }
  0x41   :  { %p851_p3 = pnand %p850_p2, %p844_p13 }
  0x43   :  { %854 = shalt.err (!%p851_p3)
}
  0x44   :  { %70 = dma.hbm_to_vmem [thread:$0]  %s997_s8, 16, %s68_s28, [#allocation8]  }
  0x45   :  { %855 = dma.done.wait [#allocation3], 128  }
  0x46   :  { %856 = vsyncadd [#allocation3], 4294967168 }
  0x47   :  { %857 = dma.done.wait [#allocation5], 6144  }
  0x48   :  { %858 = vsyncadd [#allocation5], 4294961152 }
  0x49   :  { %859 = dma.done.wait [#allocation8], 16  }
  0x4a   :  { %860 = vsyncadd [#allocation8], 4294967280  ;;  %v869_v0 = vmov 0   ;;  %v700_v1 = vld [vmem:[%s990_s1 + $0x4] ss:$8 sps:$4 sm:$0xff]   ;;  %v84_v3 = vld [vmem:[#allocation2] sm:$0xff]  ;;  %v90_v49 = vlaneseq }
  0x4b   :  { %146 = vmatprep.mubr.bf16.mxu0 %v869_v0  ;;  %v702_v2 = vld [vmem:[%s990_s1] ss:$8 sps:$4 sm:$0xff]   ;;  %114 = vmatprep.subr.bf16.mxu0 %v700_v1  ;;  %v85_v4 = vpack.c.bf16 %v84_v3, %v84_v3  ;;  %v703_v5 = vld [vmem:[#allocation4 + $0x4] ss:$8 sps:$4 sm:$0xff]   ;;  %vm110_vm0 = vcmask 130048   ;;  %v757_v43 = vld [vmem:[#allocation6 + $0x58] sm:$0xff]  }
  0x4c   :  { %v705_v6 = vld [vmem:[#allocation4] ss:$8 sps:$4 sm:$0xff]   ;;  %115 = vmatpush1.bf16.msra.mxu0 %v702_v2  ;;  %v706_v7 = vld [vmem:[#allocation4 + $0x14] ss:$8 sps:$4 sm:$0xff]   ;;  %367 = vmatprep.subr.bf16.mxu1 %v703_v5  ;;  %v708_v8 = vld [vmem:[#allocation4 + $0x10] ss:$8 sps:$4 sm:$0xff]  }
  0x4d   :  { %368 = vmatpush1.bf16.msra.mxu1 %v705_v6  ;;  %v709_v9 = vld [vmem:[#allocation4 + $0x24] ss:$8 sps:$4 sm:$0xff]   ;;  %v711_v10 = vld [vmem:[#allocation4 + $0x20] ss:$8 sps:$4 sm:$0xff]   ;;  %v712_v11 = vld [vmem:[#allocation4 + $0x34] ss:$8 sps:$4 sm:$0xff]  }
  0x4e   :  { %369 = vmatprep.subr.bf16.mxu1 %v706_v7  ;;  %v714_v12 = vld [vmem:[#allocation4 + $0x30] ss:$8 sps:$4 sm:$0xff]   ;;  %v715_v13 = vld [vmem:[#allocation4 + $0x44] ss:$8 sps:$4 sm:$0xff]   ;;  %v717_v14 = vld [vmem:[#allocation4 + $0x40] ss:$8 sps:$4 sm:$0xff]  }
  0x4f   :  { %617 = vmatmul.mubr.msk.bf16.vlgmr.msra.gmra.mrb[0].mxu0 %vm110_vm0, %v85_v4  ;;  %v718_v15 = vld [vmem:[#allocation4 + $0x54] ss:$8 sps:$4 sm:$0xff]   ;;  %v720_v16 = vld [vmem:[#allocation4 + $0x50] ss:$8 sps:$4 sm:$0xff]   ;;  %v721_v17 = vld [vmem:[#allocation4 + $0x64] ss:$8 sps:$4 sm:$0xff]  }
  0x50   :  { %v723_v18 = vld [vmem:[#allocation4 + $0x60] ss:$8 sps:$4 sm:$0xff]   ;;  %v724_v19 = vld [vmem:[#allocation4 + $0x74] ss:$8 sps:$4 sm:$0xff]   ;;  %v726_v20 = vld [vmem:[#allocation4 + $0x70] ss:$8 sps:$4 sm:$0xff]  }
  0x51   :  { %370 = vmatpush1.bf16.msra.mxu1 %v708_v8  ;;  %v727_v21 = vld [vmem:[#allocation4 + $0x84] ss:$8 sps:$4 sm:$0xff]   ;;  %v729_v22 = vld [vmem:[#allocation4 + $0x80] ss:$8 sps:$4 sm:$0xff]   ;;  %v730_v23 = vld [vmem:[#allocation4 + $0x94] ss:$8 sps:$4 sm:$0xff]  }
  0x52   :  { %371 = vmatprep.subr.bf16.mxu1 %v709_v9  ;;  %v732_v24 = vld [vmem:[#allocation4 + $0x90] ss:$8 sps:$4 sm:$0xff]   ;;  %v733_v25 = vld [vmem:[#allocation4 + $0xa4] ss:$8 sps:$4 sm:$0xff]   ;;  %v735_v26 = vld [vmem:[#allocation4 + $0xa0] ss:$8 sps:$4 sm:$0xff]  }
  0x53   :  { %v736_v27 = vld [vmem:[#allocation4 + $0xb4] ss:$8 sps:$4 sm:$0xff]   ;;  %v738_v28 = vld [vmem:[#allocation4 + $0xb0] ss:$8 sps:$4 sm:$0xff]   ;;  %v739_v29 = vld [vmem:[#allocation4 + $0xc4] ss:$8 sps:$4 sm:$0xff]  }
  0x54   :  { %v741_v30 = vld [vmem:[#allocation4 + $0xc0] ss:$8 sps:$4 sm:$0xff]   ;;  %v742_v31 = vld [vmem:[#allocation4 + $0xd4] ss:$8 sps:$4 sm:$0xff]   ;;  %v744_v32 = vld [vmem:[#allocation4 + $0xd0] ss:$8 sps:$4 sm:$0xff]  }
  0x55   :  { %372 = vmatpush1.bf16.msra.mxu1 %v711_v10  ;;  %v745_v33 = vld [vmem:[#allocation4 + $0xe4] ss:$8 sps:$4 sm:$0xff]   ;;  %v747_v34 = vld [vmem:[#allocation4 + $0xe0] ss:$8 sps:$4 sm:$0xff]   ;;  %v748_v35 = vld [vmem:[#allocation4 + $0xf4] ss:$8 sps:$4 sm:$0xff]  }
  0x56   :  { %373 = vmatprep.subr.bf16.mxu1 %v712_v11  ;;  %v750_v36 = vld [vmem:[#allocation4 + $0xf0] ss:$8 sps:$4 sm:$0xff]   ;;  %v751_v37 = vld [vmem:[#allocation6 + $0x40] sm:$0xff]   ;;  %v753_v39 = vld [vmem:[#allocation6 + $0x48] sm:$0xff]   ;;  %v91_v50 = vshrl.u32 %v90_v49, 7 }
  0x57   :  { %v752_v38 = vld [vmem:[#allocation6] sm:$0xff]   ;;  %669 = vmatprep.subr.bf16.mxu0 %v751_v37  ;;  %v754_v40 = vld [vmem:[#allocation6 + $0x8] sm:$0xff]   ;;  %v755_v41 = vld [vmem:[#allocation6 + $0x50] sm:$0xff]  }
  0x58   :  { %670 = vmatpush3.bf16.msra.mxu0 %v752_v38  ;;  %v756_v42 = vld [vmem:[#allocation6 + $0x10] sm:$0xff]   ;;  %v758_v44 = vld [vmem:[#allocation6 + $0x18] sm:$0xff]   ;;  %v759_v45 = vld [vmem:[#allocation6 + $0x60] sm:$0xff]   ;;  %v92_v51 = vsub.s32 0, %v91_v50  ;;  %v96_v53 = vsub.s32 1, %v91_v50 }
  0x59   :  { %374 = vmatpush1.bf16.msra.mxu1 %v714_v12  ;;  %671 = vmatprep.subr.bf16.mxu0 %v753_v39  ;;  %v760_v46 = vld [vmem:[#allocation6 + $0x20] sm:$0xff]   ;;  %v761_v47 = vld [vmem:[#allocation6 + $0x68] sm:$0xff]   ;;  %v763_v4 = vld [vmem:[#allocation6 + $0x70] sm:$0xff]  }
  0x5a   :  { %375 = vmatprep.subr.bf16.mxu1 %v715_v13  ;;  %v762_v48 = vld [vmem:[#allocation6 + $0x28] sm:$0xff]   ;;  %v764_v5 = vld [vmem:[#allocation6 + $0x30] sm:$0xff]   ;;  %v765_v6 = vld [vmem:[#allocation6 + $0x78] sm:$0xff]  }
  0x5b   :  { %v88_v52 = vld [vmem:[%s991_s2] sm:$0x3]  ;;  %v766_v7 = vld [vmem:[#allocation6 + $0x38] sm:$0xff]  }
  0x5c   :  { %672 = vmatpush3.bf16.msra.mxu0 %v754_v40  ;;  %v93_v54 = vrot.slane %v88_v52, %v92_v51  ;;  %v97_v55 = vrot.slane %v88_v52, %v96_v53  ;;  %v195_v8 = vld [vmem:[%s993_s4] sm:$0x3] }
  0x5d   :  { %376 = vmatpush1.bf16.msra.mxu1 %v717_v14  ;;  %673 = vmatprep.subr.bf16.mxu0 %v755_v41  ;;  %v200_v9 = vrot.slane %v195_v8, %v92_v51  ;;  %v204_v10 = vrot.slane %v195_v8, %v96_v53 }
  0x5e   :  { %377 = vmatprep.subr.bf16.mxu1 %v718_v15 }
  0x60   :  { %674 = vmatpush3.bf16.msra.mxu0 %v756_v42 }
  0x61   :  { %378 = vmatpush1.bf16.msra.mxu1 %v720_v16  ;;  %675 = vmatprep.subr.bf16.mxu0 %v757_v43 }
  0x62   :  { %379 = vmatprep.subr.bf16.mxu1 %v721_v17 }
  0x64   :  { %676 = vmatpush3.bf16.msra.mxu0 %v758_v44 }
  0x65   :  { %380 = vmatpush1.bf16.msra.mxu1 %v723_v18  ;;  %677 = vmatprep.subr.bf16.mxu0 %v759_v45 }
  0x66   :  { %381 = vmatprep.subr.bf16.mxu1 %v724_v19 }
  0x68   :  { %678 = vmatpush3.bf16.msra.mxu0 %v760_v46 }
  0x69   :  { %382 = vmatpush1.bf16.msra.mxu1 %v726_v20  ;;  %679 = vmatprep.subr.bf16.mxu0 %v761_v47 }
  0x6a   :  { %383 = vmatprep.subr.bf16.mxu1 %v727_v21 }
  0x6c   :  { %680 = vmatpush3.bf16.msra.mxu0 %v762_v48 }
  0x6d   :  { %384 = vmatpush1.bf16.msra.mxu1 %v729_v22  ;;  %681 = vmatprep.subr.bf16.mxu0 %v763_v4 }
  0x6e   :  { %385 = vmatprep.subr.bf16.mxu1 %v730_v23 }
  0x70   :  { %682 = vmatpush3.bf16.msra.mxu0 %v764_v5 }
  0x71   :  { %386 = vmatpush1.bf16.msra.mxu1 %v732_v24  ;;  %683 = vmatprep.subr.bf16.mxu0 %v765_v6  ;;  %v650_v24 = vld [vmem:[%s995_s6] ss:$0 sm:$0xff] }
  0x72   :  { %387 = vmatprep.subr.bf16.mxu1 %v733_v25 }
  0x74   :  { %684 = vmatpush3.bf16.msra.mxu0 %v766_v7 }
  0x75   :  { %388 = vmatpush1.bf16.msra.mxu1 %v735_v26 }
  0x76   :  { %389 = vmatprep.subr.bf16.mxu1 %v736_v27 }
  0x79   :  { %390 = vmatpush1.bf16.msra.mxu1 %v738_v28  ;;  %v667_v28 = vld [vmem:[%s996_s7] ss:$0 sm:$0xff] }
  0x7a   :  { %391 = vmatprep.subr.bf16.mxu1 %v739_v29 }
  0x7d   :  { %392 = vmatpush1.bf16.msra.mxu1 %v741_v30 }
  0x7e   :  { %393 = vmatprep.subr.bf16.mxu1 %v742_v31  ;;  %v668_v31 = vld [vmem:[#allocation7] ss:$0 sm:$0xff] }
  0x81   :  { %394 = vmatpush1.bf16.msra.mxu1 %v744_v32 }
  0x82   :  { %395 = vmatprep.subr.bf16.mxu1 %v745_v33 }
  0x85   :  { %396 = vmatpush1.bf16.msra.mxu1 %v747_v34 }
  0x86   :  { %397 = vmatprep.subr.bf16.mxu1 %v748_v35 }
  0x89   :  { %398 = vmatpush1.bf16.msra.mxu1 %v750_v36 }
 0x122   :  { %v148_v56 = vpop.f32.mrb[0].mxu0 }
 0x123   :  { %v149_v57 = vadd.f32 %v148_v56, %v93_v54  ;;  %v150_v58 = vpop.f32.mrb[1].mxu0 }
 0x124   :  { %v151_v59 = vadd.f32 %v150_v58, %v97_v55  ;;  %v152_v60 = vpop.f32.mrb[2].mxu0 }
 0x125   :  { %vm155_vm1 = vcmp.gt.f32.partialorder %v149_v57, 0.0  ;;  %v157_v61 = vmul.f32 0.01, %v149_v57  ;;  %v153_v62 = vpop.f32.mrb[3].mxu0 }
 0x126   :  { %vm156_vm2 = vcmp.gt.f32.partialorder %v151_v59, 0.0  ;;  %v158_v63 = vmul.f32 0.01, %v151_v59 }
 0x127   :  { %v159_v0 = vsel %vm155_vm1, %v149_v57, %v157_v61 }
 0x128   :  { %v160_v1 = vsel %vm156_vm2, %v151_v59, %v158_v63  ;;  %v161_v3 = vpack.c.bf16 %v159_v0, %v159_v0 }
 0x129   :  { %v162_v2 = vpack.c.bf16 %v160_v1, %v160_v1 }
 0x12b   :  { %399 = vmatprep.mubr.bf16.mxu1 %v162_v2 }
 0x12c   :  { %400 = vmatmul.mubr.bf16.vlgmr.msra.gmra.mrb[0].mxu1 %v161_v3 }
 0x1ff   :  { %v401_v11 = vpop.f32.mrb[0].mxu1 }
 0x200   :  { %v402_v12 = vadd.f32 %v401_v11, %v200_v9  ;;  %v403_v13 = vpop.f32.mrb[1].mxu1 }
 0x201   :  { %v404_v14 = vadd.f32 %v403_v13, %v204_v10  ;;  %v405_v15 = vpop.f32.mrb[2].mxu1 }
 0x202   :  { %vm408_vm3 = vcmp.gt.f32.partialorder %v402_v12, 0.0  ;;  %v410_v16 = vmul.f32 0.01, %v402_v12  ;;  %v406_v17 = vpop.f32.mrb[3].mxu1 }
 0x203   :  { %vm409_vm4 = vcmp.gt.f32.partialorder %v404_v14, 0.0  ;;  %v411_v18 = vmul.f32 0.01, %v404_v14 }
 0x204   :  { %v412_v19 = vsel %vm408_vm3, %v402_v12, %v410_v16 }
 0x205   :  { %v413_v20 = vsel %vm409_vm4, %v404_v14, %v411_v18  ;;  %v414_v22 = vpack.c.bf16 %v412_v19, %v412_v19 }
 0x206   :  { %v415_v21 = vpack.c.bf16 %v413_v20, %v413_v20 }
 0x208   :  { %583 = vmatprep.mubr.bf16.mxu0 %v415_v21 }
 0x209   :  { %584 = vmatmul.mubr.bf16.vlgmr.msra.gmra.mrb[4].mxu0 %v414_v22 }
 0x2dc   :  { %v685_v23 = vpop.f32.mrb[4].mxu0 }
 0x2dd   :  { %v686_v25 = vpop.f32.mrb[5].mxu0 }
 0x2de   :  { %v687_v26 = vadd.f32 %v686_v25, %v685_v23  ;;  %v688_v27 = vpop.f32.mrb[6].mxu0 }
 0x2df   :  { %v689_v29 = vpop.f32.mrb[7].mxu0 }
 0x2e0   :  { %v586_v30 = vadd.f32 %v687_v26, %v650_v24 }
 0x2e2   :  { %v598_v32 = vmax.f32 %v586_v30, %v667_v28 }
 0x2e4   :  { %v606_v33 = vmin.f32 %v598_v32, %v668_v31 }
 0x2e6   :  { %607 = vst [vmem:[%s998_s9] sm:$0xff] %v606_v33 }
 0x2e7   :  { %612 = vsyncpa [#allocation3], 1 }
 0x2e8   :  { %613 = vsyncpa [#allocation5], 1 }
 0x2e9   :  { %614 = vsyncpa [#allocation8], 1 }

</bundles_post_ra>
